<compile_context>
chip_gen: v5e
topology: v5e:2x2
jax: 0.10.0
libtpu: 0.0.40
codegen_flags: <defaults>
</compile_context>

<pallas_src>
import functools

import jax
import jax.numpy as jnp
import numpy as np
from jax.experimental import pallas as pl
from jax.experimental.pallas import tpu as pltpu


def _round_up(x, m):
    return ((x + m - 1) // m) * m


def _swish_ref(v):
    return v * (1.0 / (1.0 + jnp.exp(-v)))


def _softplus_ref(v):
    return jnp.maximum(v, 0.0) + jnp.log(1.0 + jnp.exp(-jnp.abs(v)))


def _mlp_kernel(x_ref,
                w0_ref, b0_ref, w1_ref, b1_ref, w2_ref, b2_ref, w3_ref, b3_ref,
                w4_ref, b4_ref, maxlv_ref, emax_ref, emin_ref,
                out_ref, *, op, pack):
    """One (ensemble member, batch tile): 5 matmuls + swish + var head."""

    def swish(v):
        # v * sigmoid(v), sigmoid via tanh => one EUP op (no exp + reciprocal).
        return v * (0.5 * jnp.tanh(0.5 * v) + 0.5)

    def layer(h16, w_ref, b_ref):
        # bf16 MXU inputs, f32 accumulation, f32 broadcast bias add.
        return (jnp.dot(h16, w_ref[...], preferred_element_type=jnp.float32)
                + b_ref[...])

    h = swish(layer(x_ref[...], w0_ref, b0_ref)).astype(jnp.bfloat16)
    h = swish(layer(h, w1_ref, b1_ref)).astype(jnp.bfloat16)
    h = swish(layer(h, w2_ref, b2_ref)).astype(jnp.bfloat16)
    h = swish(layer(h, w3_ref, b3_ref)).astype(jnp.bfloat16)

    # Fused head: one (Hp, 2*OP) matmul; slice at lane OP (128-aligned, free).
    o = (jnp.dot(h, w4_ref[...], preferred_element_type=jnp.float32)
         + b4_ref[...])
    mean = o[:, :op]
    raw_lv = o[:, op:]

    # Collapsed logvar head (exact identity of the double-softplus + exp):
    #   var = exp(min_lv) + exp(max_lv) * sigmoid(raw_lv - max_lv)
    sig = 0.5 * jnp.tanh(0.5 * (raw_lv - maxlv_ref[...])) + 0.5
    var = emin_ref[...] + emax_ref[...] * sig

    if pack:
        # mean lives in lanes [0:half], var in [half:2*half]; all other lanes
        # of both tiles are exactly zero, so a single add packs them.
        out_ref[...] = mean + var
    else:
        out_ref[...] = jnp.concatenate([mean, var], axis=-1)


def dropout_bbpo_forward(x, weights, biases, max_logvar, min_logvar,
                         *, batch_tile=512):
    """Fused ensemble-MLP forward.

    x: (E, B, F) f32; weights[l]: (E, in_l, out_l) f32; biases[l]: (E, 1, out_l);
    max_logvar / min_logvar: (1, out/2).  Returns (mean, var), each (E, B, out/2).
    """
    w0, w1, w2, w3, w4 = weights
    b0, b1, b2, b3, b4 = biases
    E, B, F = x.shape
    H = w0.shape[-1]
    OUT = w4.shape[-1]
    half = OUT // 2

    Fp = _round_up(F, 128)
    Hp = _round_up(H, 128)
    OP = _round_up(half, 128)

    # Pack mean+var into one 128-lane block when both fit.
    pack = (2 * half <= 128)
    off = half if pack else 0          # lane offset of the logvar/var columns
    OW = OP if pack else 2 * OP        # output lane width

    B8 = _round_up(B, 8)
    TB = _round_up(min(batch_tile, B8), 8)

    def _step_vmem_bytes(tb):
        x_b = tb * Fp * 2                                   # bf16 input tile
        o_b = tb * OW * 4                                   # f32 output tile
        w_b = (Fp * Hp + 3 * Hp * Hp + Hp * 2 * OP) * 2     # bf16 weights
        bias_b = (4 * Hp + 2 * OP + 3 * OP) * 4             # f32 biases/consts
        act_b = 2 * tb * max(Hp, 2 * OP) * 4                # live f32 temps
        return 2 * (x_b + o_b + w_b) + bias_b + act_b       # x2 double-buffer

    # Cap the batch tile so the working set fits comfortably even on v7x
    # (64 MiB physical VMEM).
    VMEM_BUDGET = 24 * 1024 * 1024
    while TB > 8 and _step_vmem_bytes(TB) > VMEM_BUDGET:
        TB = _round_up(TB // 2, 8)

    Bp = _round_up(B, TB)
    nb = Bp // TB

    f32, bf16 = jnp.float32, jnp.bfloat16

    def pad_to(a, shape, dtype=f32):
        pads = [(0, s - d) for d, s in zip(a.shape, shape)]
        return jnp.pad(a.astype(f32), pads).astype(dtype)

    def place_last(a, lane_off, width):
        # Zero array of lane width `width` with `a` placed at [lane_off, ...).
        z = jnp.zeros(a.shape[:-1] + (width,), f32)
        return z.at[..., lane_off:lane_off + a.shape[-1]].set(a.astype(f32))

    # bf16 input (halves x HBM traffic & VMEM double-buffer).
    xp = pad_to(x, (E, Bp, Fp), bf16)

    w0p = pad_to(w0, (E, Fp, Hp), bf16)
    w1p = pad_to(w1, (E, Hp, Hp), bf16)
    w2p = pad_to(w2, (E, Hp, Hp), bf16)
    w3p = pad_to(w3, (E, Hp, Hp), bf16)
    b0p = pad_to(b0, (E, 1, Hp))
    b1p = pad_to(b1, (E, 1, Hp))
    b2p = pad_to(b2, (E, 1, Hp))
    b3p = pad_to(b3, (E, 1, Hp))

    # Fused head weight/bias: mean columns at lanes [0:half] of the first OP
    # lanes, logvar columns at lanes [off:off+half] of the second OP lanes.
    w4m = place_last(w4[:, :, :half], 0, OP)      # (E, H, OP)
    w4v = place_last(w4[:, :, half:], off, OP)    # (E, H, OP)
    w4f = jnp.concatenate([w4m, w4v], axis=-1)    # (E, H, 2*OP)
    w4f = jnp.pad(w4f, ((0, 0), (0, Hp - H), (0, 0))).astype(bf16)
    b4m = place_last(b4[:, :, :half], 0, OP)
    b4v = place_last(b4[:, :, half:], off, OP)
    b4f = jnp.concatenate([b4m, b4v], axis=-1)    # (E, 1, 2*OP) f32

    # Constants for the collapsed var head, placed on the same lanes as the
    # logvar columns (padded lanes stay 0 -> var is exactly 0 there).
    maxlv_p = place_last(max_logvar, off, OP)             # (1, OP)
    emax_p = place_last(jnp.exp(max_logvar), off, OP)     # (1, OP)
    emin_p = place_last(jnp.exp(min_logvar), off, OP)     # (1, OP)

    # Ensemble dim squeezed out of every block.  Weight/bias index_maps ignore
    # the batch-tile index -> DMA'd once per member, resident across tiles.
    def w_spec(shape):
        return pl.BlockSpec((None,) + shape, lambda e, b: (e, 0, 0))

    x_spec = pl.BlockSpec((None, TB, Fp), lambda e, b: (e, b, 0))
    c_spec = pl.BlockSpec((1, OP), lambda e, b: (0, 0))
    out_spec = pl.BlockSpec((None, TB, OW), lambda e, b: (e, b, 0))

    in_specs = [
        x_spec,
        w_spec((Fp, Hp)), w_spec((1, Hp)),
        w_spec((Hp, Hp)), w_spec((1, Hp)),
        w_spec((Hp, Hp)), w_spec((1, Hp)),
        w_spec((Hp, Hp)), w_spec((1, Hp)),
        w_spec((Hp, 2 * OP)), w_spec((1, 2 * OP)),
        c_spec, c_spec, c_spec,
    ]

    flops = 2 * E * Bp * (Fp * Hp + 3 * Hp * Hp + Hp * 2 * OP)
    # tanh-swish: 1 transcendental/element x 4 layers; head sigmoid: 1 on OP lanes.
    transcendentals = E * Bp * (4 * Hp + OP)
    bytes_accessed = (xp.size * 2
                      + sum(a.size * 2 for a in (w0p, w1p, w2p, w3p, w4f))
                      + sum(a.size * 4 for a in (b0p, b1p, b2p, b3p, b4f))
                      + (maxlv_p.size + emax_p.size + emin_p.size) * 4
                      + E * Bp * OW * 4)

    vmem_limit = int(min(48 * 2**20, max(32 * 2**20, 2 * _step_vmem_bytes(TB))))

    kernel = functools.partial(_mlp_kernel, op=OP, pack=pack)

    out_p = pl.pallas_call(
        kernel,
        out_shape=jax.ShapeDtypeStruct((E, Bp, OW), f32),
        grid_spec=pltpu.PrefetchScalarGridSpec(
            num_scalar_prefetch=0,
            grid=(E, nb),
            in_specs=in_specs,
            out_specs=out_spec,
        ),
        compiler_params=pltpu.CompilerParams(
            dimension_semantics=("parallel", "parallel"),
            vmem_limit_bytes=vmem_limit),
        cost_estimate=pl.CostEstimate(
            flops=flops,
            transcendentals=transcendentals,
            bytes_accessed=bytes_accessed),
    )(xp, w0p, b0p, w1p, b1p, w2p, b2p, w3p, b3p, w4f, b4f,
      maxlv_p, emax_p, emin_p)

    mean = out_p[:, :B, :half]
    if pack:
        var = out_p[:, :B, half:2 * half]
    else:
        var = out_p[:, :B, OP:OP + half]
    return mean, var


def reference_forward(x, weights, biases, max_logvar, min_logvar):
    """Pure-JAX f32 reference matching the PyTorch forward (original math)."""
    w0, w1, w2, w3, w4 = weights
    b0, b1, b2, b3, b4 = biases
    h = _swish_ref(jnp.einsum('ebi,eio->ebo', x, w0) + b0)
    h = _swish_ref(jnp.einsum('ebi,eio->ebo', h, w1) + b1)
    h = _swish_ref(jnp.einsum('ebi,eio->ebo', h, w2) + b2)
    h = _swish_ref(jnp.einsum('ebi,eio->ebo', h, w3) + b3)
    o = jnp.einsum('ebi,eio->ebo', h, w4) + b4
    half = o.shape[-1] // 2
    mean = o[..., :half]
    lv = o[..., half:]
    lv = max_logvar - _softplus_ref(max_logvar - lv)
    lv = min_logvar + _softplus_ref(lv - min_logvar)
    return mean, jnp.exp(lv)


if __name__ == "__main__":
    E, B, F, H, OUT = 3, 16, 8, 32, 8
    key = jax.random.PRNGKey(0)
    keys = jax.random.split(key, 6)

    def affine(k, e, fin, fout):
        std = 1.0 / (2.0 * np.sqrt(fin))
        w = std * jax.random.truncated_normal(k, -2.0, 2.0, (e, fin, fout),
                                              jnp.float32)
        b = jnp.zeros((e, 1, fout), jnp.float32)
        return w, b

    w0, b0 = affine(keys[0], E, F, H)
    w1, b1 = affine(keys[1], E, H, H)
    w2, b2 = affine(keys[2], E, H, H)
    w3, b3 = affine(keys[3], E, H, H)
    w4, b4 = affine(keys[4], E, H, OUT)
    x = jax.random.normal(keys[5], (E, B, F), jnp.float32)
    max_logvar = jnp.ones((1, OUT // 2), jnp.float32) * 0.5
    min_logvar = -jnp.ones((1, OUT // 2), jnp.float32) * 10.0

    weights = (w0, w1, w2, w3, w4)
    biases = (b0, b1, b2, b3, b4)

    mean, var = dropout_bbpo_forward(x, weights, biases, max_logvar, min_logvar)
    mean, var = jax.block_until_ready((mean, var))

    ref_mean, ref_var = reference_forward(x, weights, biases,
                                          max_logvar, min_logvar)

    assert mean.shape == (E, B, OUT // 2) and var.shape == (E, B, OUT // 2)
    assert bool(jnp.all(jnp.isfinite(mean))) and bool(jnp.all(jnp.isfinite(var)))
    # bf16 MXU inputs with f32 accumulation -> loose tolerance vs f32 reference.
    assert bool(jnp.allclose(mean, ref_mean, rtol=5e-2, atol=5e-2))
    assert bool(jnp.allclose(var, ref_var, rtol=5e-2, atol=5e-2))

    print("KERNEL_OK")
</pallas_src>

<mosaic_0001>
module attributes {stable_mosaic.version = 11 : i64} {
  func.func @_mlp_kernel(%arg0: i32, %arg1: i32, %arg2: memref<1x16x128xbf16, #tpu.memory_space<vmem>>, %arg3: memref<1x128x128xbf16, #tpu.memory_space<vmem>>, %arg4: memref<1x1x128xf32, #tpu.memory_space<vmem>>, %arg5: memref<1x128x128xbf16, #tpu.memory_space<vmem>>, %arg6: memref<1x1x128xf32, #tpu.memory_space<vmem>>, %arg7: memref<1x128x128xbf16, #tpu.memory_space<vmem>>, %arg8: memref<1x1x128xf32, #tpu.memory_space<vmem>>, %arg9: memref<1x128x128xbf16, #tpu.memory_space<vmem>>, %arg10: memref<1x1x128xf32, #tpu.memory_space<vmem>>, %arg11: memref<1x128x256xbf16, #tpu.memory_space<vmem>>, %arg12: memref<1x1x256xf32, #tpu.memory_space<vmem>>, %arg13: memref<1x128xf32, #tpu.memory_space<vmem>>, %arg14: memref<1x128xf32, #tpu.memory_space<vmem>>, %arg15: memref<1x128xf32, #tpu.memory_space<vmem>>, %arg16: memref<1x16x128xf32, #tpu.memory_space<vmem>>) attributes {dimension_semantics = [#tpu.dimension_semantics<parallel>, #tpu.dimension_semantics<parallel>], iteration_bounds = array<i64: 3, 1>, scalar_prefetch = 0 : i64, scratch_operands = 0 : i64, tpu.core_type = #tpu.core_type<tc>, window_params = [{transform_indices = @transform_0, window_bounds = array<i64: 1, 16, 128>}, {transform_indices = @transform_1, window_bounds = array<i64: 1, 128, 128>}, {transform_indices = @transform_2, window_bounds = array<i64: 1, 1, 128>}, {transform_indices = @transform_3, window_bounds = array<i64: 1, 128, 128>}, {transform_indices = @transform_4, window_bounds = array<i64: 1, 1, 128>}, {transform_indices = @transform_5, window_bounds = array<i64: 1, 128, 128>}, {transform_indices = @transform_6, window_bounds = array<i64: 1, 1, 128>}, {transform_indices = @transform_7, window_bounds = array<i64: 1, 128, 128>}, {transform_indices = @transform_8, window_bounds = array<i64: 1, 1, 128>}, {transform_indices = @transform_9, window_bounds = array<i64: 1, 128, 256>}, {transform_indices = @transform_10, window_bounds = array<i64: 1, 1, 256>}, {pipeline_mode = #tpu.pipeline_mode<synchronous>, transform_indices = @transform_11, window_bounds = array<i64: 1, 128>}, {pipeline_mode = #tpu.pipeline_mode<synchronous>, transform_indices = @transform_12, window_bounds = array<i64: 1, 128>}, {pipeline_mode = #tpu.pipeline_mode<synchronous>, transform_indices = @transform_13, window_bounds = array<i64: 1, 128>}, {transform_indices = @transform_14, window_bounds = array<i64: 1, 16, 128>}]} {
    %c0 = arith.constant 0 : index
    %c0_0 = arith.constant 0 : index
    %c0_1 = arith.constant 0 : index
    %0 = vector.load %arg2[%c0, %c0_0, %c0_1] : memref<1x16x128xbf16, #tpu.memory_space<vmem>>, vector<1x16x128xbf16>
    %1 = vector.shape_cast %0 : vector<1x16x128xbf16> to vector<16x128xbf16>
    %c0_2 = arith.constant 0 : index
    %c0_3 = arith.constant 0 : index
    %c0_4 = arith.constant 0 : index
    %2 = vector.load %arg3[%c0_2, %c0_3, %c0_4] : memref<1x128x128xbf16, #tpu.memory_space<vmem>>, vector<1x128x128xbf16>
    %3 = vector.shape_cast %2 : vector<1x128x128xbf16> to vector<128x128xbf16>
    %cst = arith.constant dense<0.000000e+00> : vector<16x128xf32>
    %4 = tpu.matmul %1, %3, %cst {dimension_numbers = #tpu.dot_dimension_numbers<[1], [0], [0], [1], [0, 0, 1, 1], [], []>} : vector<16x128xbf16>, vector<128x128xbf16>, vector<16x128xf32> -> vector<16x128xf32>
    %c0_5 = arith.constant 0 : index
    %c0_6 = arith.constant 0 : index
    %c0_7 = arith.constant 0 : index
    %5 = vector.load %arg4[%c0_5, %c0_6, %c0_7] : memref<1x1x128xf32, #tpu.memory_space<vmem>>, vector<1x1x128xf32>
    %6 = vector.shape_cast %5 : vector<1x1x128xf32> to vector<1x128xf32>
    %7 = vector.broadcast %6 : vector<1x128xf32> to vector<16x128xf32>
    %8 = arith.addf %4, %7 : vector<16x128xf32>
    %cst_8 = arith.constant 5.000000e-01 : f32
    %9 = vector.broadcast %cst_8 : f32 to vector<16x128xf32>
    %10 = arith.mulf %9, %8 : vector<16x128xf32>
    %11 = math.tanh %10 : vector<16x128xf32>
    %cst_9 = arith.constant 5.000000e-01 : f32
    %12 = vector.broadcast %cst_9 : f32 to vector<16x128xf32>
    %13 = arith.mulf %12, %11 : vector<16x128xf32>
    %cst_10 = arith.constant 5.000000e-01 : f32
    %14 = vector.broadcast %cst_10 : f32 to vector<16x128xf32>
    %15 = arith.addf %13, %14 : vector<16x128xf32>
    %16 = arith.mulf %8, %15 : vector<16x128xf32>
    %17 = arith.truncf %16 : vector<16x128xf32> to vector<16x128xbf16>
    %c0_11 = arith.constant 0 : index
    %c0_12 = arith.constant 0 : index
    %c0_13 = arith.constant 0 : index
    %18 = vector.load %arg5[%c0_11, %c0_12, %c0_13] : memref<1x128x128xbf16, #tpu.memory_space<vmem>>, vector<1x128x128xbf16>
    %19 = vector.shape_cast %18 : vector<1x128x128xbf16> to vector<128x128xbf16>
    %cst_14 = arith.constant dense<0.000000e+00> : vector<16x128xf32>
    %20 = tpu.matmul %17, %19, %cst_14 {dimension_numbers = #tpu.dot_dimension_numbers<[1], [0], [0], [1], [0, 0, 1, 1], [], []>} : vector<16x128xbf16>, vector<128x128xbf16>, vector<16x128xf32> -> vector<16x128xf32>
    %c0_15 = arith.constant 0 : index
    %c0_16 = arith.constant 0 : index
    %c0_17 = arith.constant 0 : index
    %21 = vector.load %arg6[%c0_15, %c0_16, %c0_17] : memref<1x1x128xf32, #tpu.memory_space<vmem>>, vector<1x1x128xf32>
    %22 = vector.shape_cast %21 : vector<1x1x128xf32> to vector<1x128xf32>
    %23 = vector.broadcast %22 : vector<1x128xf32> to vector<16x128xf32>
    %24 = arith.addf %20, %23 : vector<16x128xf32>
    %cst_18 = arith.constant 5.000000e-01 : f32
    %25 = vector.broadcast %cst_18 : f32 to vector<16x128xf32>
    %26 = arith.mulf %25, %24 : vector<16x128xf32>
    %27 = math.tanh %26 : vector<16x128xf32>
    %cst_19 = arith.constant 5.000000e-01 : f32
    %28 = vector.broadcast %cst_19 : f32 to vector<16x128xf32>
    %29 = arith.mulf %28, %27 : vector<16x128xf32>
    %cst_20 = arith.constant 5.000000e-01 : f32
    %30 = vector.broadcast %cst_20 : f32 to vector<16x128xf32>
    %31 = arith.addf %29, %30 : vector<16x128xf32>
    %32 = arith.mulf %24, %31 : vector<16x128xf32>
    %33 = arith.truncf %32 : vector<16x128xf32> to vector<16x128xbf16>
    %c0_21 = arith.constant 0 : index
    %c0_22 = arith.constant 0 : index
    %c0_23 = arith.constant 0 : index
    %34 = vector.load %arg7[%c0_21, %c0_22, %c0_23] : memref<1x128x128xbf16, #tpu.memory_space<vmem>>, vector<1x128x128xbf16>
    %35 = vector.shape_cast %34 : vector<1x128x128xbf16> to vector<128x128xbf16>
    %cst_24 = arith.constant dense<0.000000e+00> : vector<16x128xf32>
    %36 = tpu.matmul %33, %35, %cst_24 {dimension_numbers = #tpu.dot_dimension_numbers<[1], [0], [0], [1], [0, 0, 1, 1], [], []>} : vector<16x128xbf16>, vector<128x128xbf16>, vector<16x128xf32> -> vector<16x128xf32>
    %c0_25 = arith.constant 0 : index
    %c0_26 = arith.constant 0 : index
    %c0_27 = arith.constant 0 : index
    %37 = vector.load %arg8[%c0_25, %c0_26, %c0_27] : memref<1x1x128xf32, #tpu.memory_space<vmem>>, vector<1x1x128xf32>
    %38 = vector.shape_cast %37 : vector<1x1x128xf32> to vector<1x128xf32>
    %39 = vector.broadcast %38 : vector<1x128xf32> to vector<16x128xf32>
    %40 = arith.addf %36, %39 : vector<16x128xf32>
    %cst_28 = arith.constant 5.000000e-01 : f32
    %41 = vector.broadcast %cst_28 : f32 to vector<16x128xf32>
    %42 = arith.mulf %41, %40 : vector<16x128xf32>
    %43 = math.tanh %42 : vector<16x128xf32>
    %cst_29 = arith.constant 5.000000e-01 : f32
    %44 = vector.broadcast %cst_29 : f32 to vector<16x128xf32>
    %45 = arith.mulf %44, %43 : vector<16x128xf32>
    %cst_30 = arith.constant 5.000000e-01 : f32
    %46 = vector.broadcast %cst_30 : f32 to vector<16x128xf32>
    %47 = arith.addf %45, %46 : vector<16x128xf32>
    %48 = arith.mulf %40, %47 : vector<16x128xf32>
    %49 = arith.truncf %48 : vector<16x128xf32> to vector<16x128xbf16>
    %c0_31 = arith.constant 0 : index
    %c0_32 = arith.constant 0 : index
    %c0_33 = arith.constant 0 : index
    %50 = vector.load %arg9[%c0_31, %c0_32, %c0_33] : memref<1x128x128xbf16, #tpu.memory_space<vmem>>, vector<1x128x128xbf16>
    %51 = vector.shape_cast %50 : vector<1x128x128xbf16> to vector<128x128xbf16>
    %cst_34 = arith.constant dense<0.000000e+00> : vector<16x128xf32>
    %52 = tpu.matmul %49, %51, %cst_34 {dimension_numbers = #tpu.dot_dimension_numbers<[1], [0], [0], [1], [0, 0, 1, 1], [], []>} : vector<16x128xbf16>, vector<128x128xbf16>, vector<16x128xf32> -> vector<16x128xf32>
    %c0_35 = arith.constant 0 : index
    %c0_36 = arith.constant 0 : index
    %c0_37 = arith.constant 0 : index
    %53 = vector.load %arg10[%c0_35, %c0_36, %c0_37] : memref<1x1x128xf32, #tpu.memory_space<vmem>>, vector<1x1x128xf32>
    %54 = vector.shape_cast %53 : vector<1x1x128xf32> to vector<1x128xf32>
    %55 = vector.broadcast %54 : vector<1x128xf32> to vector<16x128xf32>
    %56 = arith.addf %52, %55 : vector<16x128xf32>
    %cst_38 = arith.constant 5.000000e-01 : f32
    %57 = vector.broadcast %cst_38 : f32 to vector<16x128xf32>
    %58 = arith.mulf %57, %56 : vector<16x128xf32>
    %59 = math.tanh %58 : vector<16x128xf32>
    %cst_39 = arith.constant 5.000000e-01 : f32
    %60 = vector.broadcast %cst_39 : f32 to vector<16x128xf32>
    %61 = arith.mulf %60, %59 : vector<16x128xf32>
    %cst_40 = arith.constant 5.000000e-01 : f32
    %62 = vector.broadcast %cst_40 : f32 to vector<16x128xf32>
    %63 = arith.addf %61, %62 : vector<16x128xf32>
    %64 = arith.mulf %56, %63 : vector<16x128xf32>
    %65 = arith.truncf %64 : vector<16x128xf32> to vector<16x128xbf16>
    %c0_41 = arith.constant 0 : index
    %c0_42 = arith.constant 0 : index
    %c0_43 = arith.constant 0 : index
    %66 = vector.load %arg11[%c0_41, %c0_42, %c0_43] : memref<1x128x256xbf16, #tpu.memory_space<vmem>>, vector<1x128x256xbf16>
    %67 = vector.shape_cast %66 : vector<1x128x256xbf16> to vector<128x256xbf16>
    %cst_44 = arith.constant dense<0.000000e+00> : vector<16x256xf32>
    %68 = tpu.matmul %65, %67, %cst_44 {dimension_numbers = #tpu.dot_dimension_numbers<[1], [0], [0], [1], [0, 0, 1, 1], [], []>} : vector<16x128xbf16>, vector<128x256xbf16>, vector<16x256xf32> -> vector<16x256xf32>
    %c0_45 = arith.constant 0 : index
    %c0_46 = arith.constant 0 : index
    %c0_47 = arith.constant 0 : index
    %69 = vector.load %arg12[%c0_45, %c0_46, %c0_47] : memref<1x1x256xf32, #tpu.memory_space<vmem>>, vector<1x1x256xf32>
    %70 = vector.shape_cast %69 : vector<1x1x256xf32> to vector<1x256xf32>
    %71 = vector.broadcast %70 : vector<1x256xf32> to vector<16x256xf32>
    %72 = arith.addf %68, %71 : vector<16x256xf32>
    %73 = vector.extract_strided_slice %72 {offsets = [0, 0], sizes = [16, 128], strides = [1, 1]} : vector<16x256xf32> to vector<16x128xf32>
    %74 = vector.extract_strided_slice %72 {offsets = [0, 128], sizes = [16, 128], strides = [1, 1]} : vector<16x256xf32> to vector<16x128xf32>
    %c0_48 = arith.constant 0 : index
    %c0_49 = arith.constant 0 : index
    %75 = vector.load %arg13[%c0_48, %c0_49] : memref<1x128xf32, #tpu.memory_space<vmem>>, vector<1x128xf32>
    %76 = vector.broadcast %75 : vector<1x128xf32> to vector<16x128xf32>
    %77 = arith.subf %74, %76 : vector<16x128xf32>
    %cst_50 = arith.constant 5.000000e-01 : f32
    %78 = vector.broadcast %cst_50 : f32 to vector<16x128xf32>
    %79 = arith.mulf %78, %77 : vector<16x128xf32>
    %80 = math.tanh %79 : vector<16x128xf32>
    %cst_51 = arith.constant 5.000000e-01 : f32
    %81 = vector.broadcast %cst_51 : f32 to vector<16x128xf32>
    %82 = arith.mulf %81, %80 : vector<16x128xf32>
    %cst_52 = arith.constant 5.000000e-01 : f32
    %83 = vector.broadcast %cst_52 : f32 to vector<16x128xf32>
    %84 = arith.addf %82, %83 : vector<16x128xf32>
    %c0_53 = arith.constant 0 : index
    %c0_54 = arith.constant 0 : index
    %85 = vector.load %arg15[%c0_53, %c0_54] : memref<1x128xf32, #tpu.memory_space<vmem>>, vector<1x128xf32>
    %c0_55 = arith.constant 0 : index
    %c0_56 = arith.constant 0 : index
    %86 = vector.load %arg14[%c0_55, %c0_56] : memref<1x128xf32, #tpu.memory_space<vmem>>, vector<1x128xf32>
    %87 = vector.broadcast %86 : vector<1x128xf32> to vector<16x128xf32>
    %88 = arith.mulf %87, %84 : vector<16x128xf32>
    %89 = vector.broadcast %85 : vector<1x128xf32> to vector<16x128xf32>
    %90 = arith.addf %89, %88 : vector<16x128xf32>
    %91 = arith.addf %73, %90 : vector<16x128xf32>
    %c0_57 = arith.constant 0 : index
    %c0_58 = arith.constant 0 : index
    %c0_59 = arith.constant 0 : index
    %92 = vector.load %arg16[%c0_57, %c0_58, %c0_59] : memref<1x16x128xf32, #tpu.memory_space<vmem>>, vector<1x16x128xf32>
    %93 = vector.shape_cast %92 : vector<1x16x128xf32> to vector<16x128xf32>
    %94 = vector.shape_cast %91 : vector<16x128xf32> to vector<1x16x128xf32>
    tpu.vector_store %arg16[%c0_57, %c0_58, %c0_59], %94 {strides = array<i32>} : memref<1x16x128xf32, #tpu.memory_space<vmem>>, vector<1x16x128xf32>,
    return
  }
  func.func @transform_0(%arg0: i32, %arg1: i32) -> (i32, i32, i32) {
    %c0_i32 = arith.constant 0 : i32
    %c0_i32_0 = arith.constant 0 : i32
    return %arg0, %arg1, %c0_i32 : i32, i32, i32
  }
  func.func @transform_1(%arg0: i32, %arg1: i32) -> (i32, i32, i32) {
    %c0_i32 = arith.constant 0 : i32
    %c0_i32_0 = arith.constant 0 : i32
    %c0_i32_1 = arith.constant 0 : i32
    return %arg0, %c0_i32, %c0_i32_0 : i32, i32, i32
  }
  func.func @transform_2(%arg0: i32, %arg1: i32) -> (i32, i32, i32) {
    %c0_i32 = arith.constant 0 : i32
    %c0_i32_0 = arith.constant 0 : i32
    %c0_i32_1 = arith.constant 0 : i32
    return %arg0, %c0_i32, %c0_i32_0 : i32, i32, i32
  }
  func.func @transform_3(%arg0: i32, %arg1: i32) -> (i32, i32, i32) {
    %c0_i32 = arith.constant 0 : i32
    %c0_i32_0 = arith.constant 0 : i32
    %c0_i32_1 = arith.constant 0 : i32
    return %arg0, %c0_i32, %c0_i32_0 : i32, i32, i32
  }
  func.func @transform_4(%arg0: i32, %arg1: i32) -> (i32, i32, i32) {
    %c0_i32 = arith.constant 0 : i32
    %c0_i32_0 = arith.constant 0 : i32
    %c0_i32_1 = arith.constant 0 : i32
    return %arg0, %c0_i32, %c0_i32_0 : i32, i32, i32
  }
  func.func @transform_5(%arg0: i32, %arg1: i32) -> (i32, i32, i32) {
    %c0_i32 = arith.constant 0 : i32
    %c0_i32_0 = arith.constant 0 : i32
    %c0_i32_1 = arith.constant 0 : i32
    return %arg0, %c0_i32, %c0_i32_0 : i32, i32, i32
  }
  func.func @transform_6(%arg0: i32, %arg1: i32) -> (i32, i32, i32) {
    %c0_i32 = arith.constant 0 : i32
    %c0_i32_0 = arith.constant 0 : i32
    %c0_i32_1 = arith.constant 0 : i32
    return %arg0, %c0_i32, %c0_i32_0 : i32, i32, i32
  }
  func.func @transform_7(%arg0: i32, %arg1: i32) -> (i32, i32, i32) {
    %c0_i32 = arith.constant 0 : i32
    %c0_i32_0 = arith.constant 0 : i32
    %c0_i32_1 = arith.constant 0 : i32
    return %arg0, %c0_i32, %c0_i32_0 : i32, i32, i32
  }
  func.func @transform_8(%arg0: i32, %arg1: i32) -> (i32, i32, i32) {
    %c0_i32 = arith.constant 0 : i32
    %c0_i32_0 = arith.constant 0 : i32
    %c0_i32_1 = arith.constant 0 : i32
    return %arg0, %c0_i32, %c0_i32_0 : i32, i32, i32
  }
  func.func @transform_9(%arg0: i32, %arg1: i32) -> (i32, i32, i32) {
    %c0_i32 = arith.constant 0 : i32
    %c0_i32_0 = arith.constant 0 : i32
    %c0_i32_1 = arith.constant 0 : i32
    return %arg0, %c0_i32, %c0_i32_0 : i32, i32, i32
  }
  func.func @transform_10(%arg0: i32, %arg1: i32) -> (i32, i32, i32) {
    %c0_i32 = arith.constant 0 : i32
    %c0_i32_0 = arith.constant 0 : i32
    %c0_i32_1 = arith.constant 0 : i32
    return %arg0, %c0_i32, %c0_i32_0 : i32, i32, i32
  }
  func.func @transform_11(%arg0: i32, %arg1: i32) -> (i32, i32) {
    %c0_i32 = arith.constant 0 : i32
    %c0_i32_0 = arith.constant 0 : i32
    %c0_i32_1 = arith.constant 0 : i32
    return %c0_i32, %c0_i32_0 : i32, i32
  }
  func.func @transform_12(%arg0: i32, %arg1: i32) -> (i32, i32) {
    %c0_i32 = arith.constant 0 : i32
    %c0_i32_0 = arith.constant 0 : i32
    %c0_i32_1 = arith.constant 0 : i32
    return %c0_i32, %c0_i32_0 : i32, i32
  }
  func.func @transform_13(%arg0: i32, %arg1: i32) -> (i32, i32) {
    %c0_i32 = arith.constant 0 : i32
    %c0_i32_0 = arith.constant 0 : i32
    %c0_i32_1 = arith.constant 0 : i32
    return %c0_i32, %c0_i32_0 : i32, i32
  }
  func.func @transform_14(%arg0: i32, %arg1: i32) -> (i32, i32, i32) {
    %c0_i32 = arith.constant 0 : i32
    %c0_i32_0 = arith.constant 0 : i32
    return %arg0, %arg1, %c0_i32 : i32, i32, i32
  }
}

</mosaic_0001>

<bundles_post_ra>
// kernel: tpu_custom_call.1
= control target key start
LH: loop header
LB: loop body
LE: loop exit
PB: predicated region body
PF: predicated region fallthrough
CT: control target
= control target key end

     0   :  { %s2906_s0 = inlined_call_operand.hbm [shape: bf16[3,16,128], index: 0, kind: input, shape index: {}]   ;;  %s2907_s1 = inlined_call_operand.hbm [shape: bf16[3,128,128], index: 1, kind: input, shape index: {}]   ;;  %s2908_s2 = inlined_call_operand.hbm [shape: f32[3,1,128], index: 2, kind: input, shape index: {}]   ;;  %s2909_s3 = inlined_call_operand.hbm [shape: bf16[3,128,128], index: 3, kind: input, shape index: {}]   ;;  %s2910_s4 = inlined_call_operand.vmem [shape: f32[3,1,128], index: 4, kind: input, shape index: {}]   ;;  %s2911_s5 = inlined_call_operand.hbm [shape: bf16[3,128,128], index: 5, kind: input, shape index: {}]   ;;  %s2912_s6 = inlined_call_operand.hbm [shape: f32[3,1,128], index: 6, kind: input, shape index: {}]   ;;  %s2913_s7 = inlined_call_operand.hbm [shape: bf16[3,128,128], index: 7, kind: input, shape index: {}]   ;;  %s2914_s8 = inlined_call_operand.hbm [shape: f32[3,1,128], index: 8, kind: input, shape index: {}]   ;;  %s2915_s9 = inlined_call_operand.hbm [shape: bf16[3,128,256], index: 9, kind: input, shape index: {}]   ;;  %s2916_s10 = inlined_call_operand.vmem [shape: f32[3,1,256], index: 10, kind: input, shape index: {}]   ;;  %s2917_s11 = inlined_call_operand.vmem [shape: f32[1,128], index: 11, kind: input, shape index: {}]   ;;  %s2918_s12 = inlined_call_operand.vmem [shape: f32[1,128], index: 12, kind: input, shape index: {}]   ;;  %s2919_s13 = inlined_call_operand.vmem [shape: f32[1,128], index: 13, kind: input, shape index: {}]   ;;  %s2920_s14 = inlined_call_operand.hbm [shape: f32[3,16,128], index: 14, kind: output, shape index: {}]  }
   0x1   :  { %2936 = sst [smem:[#allocation32_spill]] %s2907_s1 }
   0x2   :  { %2937 = sst [smem:[#allocation33_spill]] %s2909_s3 }
   0x3   :  { %2938 = sst [smem:[#allocation34_spill]] %s2910_s4 }
   0x4   :  { %2939 = sst [smem:[#allocation35_spill]] %s2916_s10 }
   0x5   :  { %2940 = sst [smem:[#allocation36_spill]] %s2917_s11 }
   0x6   :  { %2941 = sst [smem:[#allocation37_spill]] %s2918_s12 }
   0x7   :  { %2942 = sst [smem:[#allocation38_spill]] %s2919_s13 }
   0x8   :  { %2943 = sst [smem:[#allocation39_spill]] %s2920_s14 }
   0x9   :  { %19 = vsyncpa [#allocation3], 0 }
   0xa   :  { %21 = vsyncpa [#allocation3 + $0x1], 0 }
   0xb   :  { %22 = vsyncpa [#allocation6], 0 }
   0xc   :  { %24 = vsyncpa [#allocation6 + $0x1], 0 }
   0xd   :  { %25 = vsyncpa [#allocation9], 0 }
   0xe   :  { %27 = vsyncpa [#allocation9 + $0x1], 0 }
   0xf   :  { %28 = vsyncpa [#allocation12], 0 }
  0x10   :  { %30 = vsyncpa [#allocation12 + $0x1], 0 }
  0x11   :  { %31 = vsyncpa [#allocation15], 0 }
  0x12   :  { %33 = vsyncpa [#allocation15 + $0x1], 0 }
  0x13   :  { %34 = vsyncpa [#allocation4], 0 }
  0x14   :  { %36 = vsyncpa [#allocation4 + $0x1], 0  ;;  %s2542_s29 = smov 0   ;;  %s2544_s30 = smov 0  }
  0x15   :  { %s2546_s15 = smov 0   ;;  %s2548_s16 = smov 0  }
  0x16   :  { %s2550_s17 = smov 0   ;;  %s2552_s18 = smov 0  }
  0x17 LB: > { %2944 = sst [smem:[#allocation24_spill]] %s2439_s29  ;;  %s2573_s19 = sadd.s32 4294967295, %s2459_s18   ;;  %s2459_s18 = sphi %s2552_s18, %s42_s18   ;;  %s2455_s17 = sphi %s2550_s17, %s2980_s17   ;;  %s2451_s16 = sphi %s2548_s16, %s2979_s16   ;;  %s2447_s15 = sphi %s2546_s15, %s2975_s15   ;;  %s2443_s30 = sphi %s2544_s30, %s2978_s30   ;;  %s2439_s29 = sphi %s2542_s29, %s2977_s29  }
  0x18   : > { %2945 = sst [smem:[#allocation25_spill]] %s2447_s15  ;;  %s1669_s20 = sadd.s32 4294967294, %s2459_s18  }
  0x19   : > { %2946 = sst [smem:[#allocation26_spill]] %s2451_s16  ;;  %s54_s21 = sadd.s32 1, %s2455_s17 }
  0x1a   : > { %2947 = sst [smem:[#allocation27_spill]] %s2459_s18  ;;  %s63_s22 = sadd.s32 1, %s2447_s15 }
  0x1b   : > { %p56_p0 = scmp.ge.s32.totalorder %s54_s21, 3  ;;  %p70_p1 = scmp.ne.s32.totalorder %s2447_s15, %s2443_s30 }
  0x1c   : > { %p71_p2 = scmp.eq.s32.totalorder %s2459_s18, 0  ;;  %p76_p3 = scmp.ne.s32.totalorder %s2443_s30, %s2439_s29 }
  0x1d   : > { %s2982_s21 = smov (%p56_p0, %s54_s21), 0  ;;  %p77_p5 = scmp.eq.s32.totalorder %s2573_s19, 0 }
  0x1e   : > { %2948 = sst [smem:[#allocation28_spill]] %s2982_s21  ;;  %p72_p4 = por %p71_p2, %p70_p1 }
  0x1f   : > { %s58_s23 = ssub.s32 %s2455_s17, %s2982_s21  ;;  %p425_p6 = scmp.eq.s32.totalorder %s2573_s19, 2 }
  0x20   : > { %p61_p7 = scmp.eq.s32.totalorder %s58_s23, 0  ;;  %p2589_p8 = por %p77_p5, %p76_p3 }
  0x21   : > { %p2593_p9 = por %p425_p6, %p70_p1  ;;  %p431_p10 = scmp.eq.s32.totalorder %s1669_s20, 2 }
  0x22   : > { %s2598_s26 = scalar_select %p61_p7, %s2447_s15, %s63_s22  }
  0x23   : > { %s2950_s25 = scalar_select %p2593_p9, 1, 0 }
  0x24   : > { %2952 = sst [smem:[#allocation30_spill]] %s2598_s26  ;;  %p2600_p11 = por %p431_p10, %p76_p3 }
  0x25   : > { %2951 = sst [smem:[#allocation29_spill]] %s2950_s25  ;;  %p2008_p12 = scmp.lt.s32.totalorder %s2459_s18, 3 }
  0x26   : > { %s2953_s27 = scalar_select %p2600_p11, 1, 0 }
  0x27   : > { %s2606_s28 = sand.u32 1, %s2447_s15   ;;  %p2608_p13 = pnand %p2008_p12, %p72_p4 }
  0x28   : > { %2954 = sst [smem:[#allocation31_spill]] %s2953_s27  ;;  %s2613_s21 = sand.u32 1, %s2459_s18  }
  0x29   : > { %s2616_s20 = sshll.u32 %s2606_s28, 6  ;;  %s2619_s22 = sshll.u32 %s2455_s17, 6 }
  0x2a   : > { %s488_s26 = scalar_lea.vmem [#allocation5], %s2616_s20  ;;  %s2956_s1 = sld [smem:[#allocation32_spill]] }
  0x2b   : > { %s496_s15 = sshll.u32 %s488_s26, 4  ;;  %p1690_p0 = scmp.ge.s32.totalorder %s2459_s18, 1  ;;  %s497_s15 = int_to_ptr.vmem [resolvable:$true] %s496_s15 }
  0x2c   : > { %p656_p1 = scmp.lt.s32.totalorder %s2459_s18, 4  ;;  %s2931_s13 = scalar_lea.sflag [#allocation6], %s2613_s21 }
  0x2d   : > { %s2461_s12 = smov 64   ;;  %s2462_s11 = smov 4  }
  0x2e   : > { %p2636_p2 = pnand %p1690_p0, %p656_p1  ;;  %s2958_s3 = sld [smem:[#allocation33_spill]] }
  0x2f   : > { %s527_s18 = scalar_lea.vmem [#allocation8], %s2616_s20  ;;  %s2934_s4 = scalar_lea.sflag [#allocation9], %s2613_s21 }
  0x30   : > { %s493_s25 = scalar_lea.hbm %s2956_s1, %s2619_s22  ;;  %s535_s10 = sshll.u32 %s527_s18, 4  ;;  %s536_s10 = int_to_ptr.vmem [resolvable:$true] %s535_s10 }
  0x31   : > { %s494_s14 = sshll.u32 %s493_s25, 4  ;;  %s579_s25 = scalar_lea.hbm %s2912_s6, %s2455_s17  ;;  %s495_s14 = int_to_ptr.hbm [resolvable:$true] %s494_s14 }
  0x32   : > { %1982 = dma.hbm_to_vmem [thread:$0]  (!%p2608_p13), %s495_s14, 1024, %s497_s15, %s2931_s13, %s2461_s12, %s2461_s12, %s2462_s11  }
  0x33   : > { %s576_s26 = scalar_lea.vmem [#allocation11], %s2606_s28  ;;  %s2933_s13 = scalar_lea.sflag [#allocation12], %s2613_s21 }
  0x34   : > { %s532_s27 = scalar_lea.hbm %s2958_s3, %s2619_s22  ;;  %s583_s18 = sshll.u32 %s576_s26, 4  ;;  %s584_s18 = int_to_ptr.vmem [resolvable:$true] %s583_s18 }
  0x35   : > { %s533_s1 = sshll.u32 %s532_s27, 4  ;;  %s581_s27 = sshll.u32 %s579_s25, 4  ;;  %s534_s1 = int_to_ptr.hbm [resolvable:$true] %s533_s1  ;;  %s582_s27 = int_to_ptr.hbm [resolvable:$true] %s581_s27 }
  0x36   : > { %1988 = dma.hbm_to_vmem [thread:$0]  (!%p2608_p13), %s534_s1, 1024, %s536_s10, %s2934_s4, %s2461_s12, %s2461_s12, %s2462_s11  }
  0x37   : > { %1994 = dma.hbm_to_vmem [thread:$0]  (!%p2608_p13), %s582_s27, 16, %s584_s18, %s2933_s13  }
  0x38   : > { %s618_s1 = scalar_lea.hbm %s2914_s8, %s2455_s17  ;;  %s615_s14 = scalar_lea.vmem [#allocation14], %s2606_s28 }
  0x39   : > { %s620_s10 = sshll.u32 %s618_s1, 4  ;;  %s622_s15 = sshll.u32 %s615_s14, 4  ;;  %s621_s10 = int_to_ptr.hbm [resolvable:$true] %s620_s10  ;;  %s623_s15 = int_to_ptr.vmem [resolvable:$true] %s622_s15 }
  0x3a   : > { %s2935_s25 = scalar_lea.sflag [#allocation15], %s2613_s21  ;;  %s1672_s26 = sshll.u32 %s2606_s28, 3 }
  0x3b   : > { %2000 = dma.hbm_to_vmem [thread:$0]  (!%p2608_p13), %s621_s10, 16, %s623_s15, %s2935_s25  }
  0x3c   : > { %s1900_s18 = sshll.u32 %s2455_s17, 3  ;;  %s464_s1 = scalar_lea.vmem [#allocation2], %s1672_s26 }
  0x3d   : > { %s471_s16 = scalar_lea.hbm %s2906_s0, %s1900_s18  ;;  %s474_s13 = sshll.u32 %s464_s1, 4  ;;  %s475_s13 = int_to_ptr.vmem [resolvable:$true] %s474_s13 }
  0x3e   : > { %s472_s14 = sshll.u32 %s471_s16, 4  ;;  %s461_s4 = scalar_lea.sflag [#allocation3], %s2606_s28  ;;  %s473_s14 = int_to_ptr.hbm [resolvable:$true] %s472_s14 }
  0x3f   : > { %1979 = dma.hbm_to_vmem [thread:$0]  (!%p2608_p13), %s473_s14, 128, %s475_s13, %s461_s4, %s2461_s12, %s2461_s12, %s2462_s11  }
  0x40   : > { %s512_s18 = scalar_lea.hbm %s2908_s2, %s2455_s17  ;;  %s509_s27 = scalar_lea.vmem [#allocation7], %s2606_s28 }
  0x41   : > { %s516_s26 = sshll.u32 %s509_s27, 4  ;;  %s514_s3 = sshll.u32 %s512_s18, 4  ;;  %s517_s26 = int_to_ptr.vmem [resolvable:$true] %s516_s26  ;;  %s515_s3 = int_to_ptr.hbm [resolvable:$true] %s514_s3 }
  0x42   : > { %s2959_s16 = scalar_lea.sflag [#allocation6], %s2613_s21  ;;  %s560_s4 = scalar_lea.hbm %s2911_s5, %s2619_s22 }
  0x43   : > { %1985 = dma.hbm_to_vmem [thread:$0]  (!%p2608_p13), %s515_s3, 16, %s517_s26, %s2959_s16  }
  0x44   : > { %s555_s13 = scalar_lea.vmem [#allocation10], %s2616_s20  ;;  %s561_s10 = sshll.u32 %s560_s4, 4  ;;  %s562_s10 = int_to_ptr.hbm [resolvable:$true] %s561_s10 }
  0x45   : > { %s563_s14 = sshll.u32 %s555_s13, 4  ;;  %s2960_s15 = scalar_lea.sflag [#allocation9], %s2613_s21  ;;  %s564_s14 = int_to_ptr.vmem [resolvable:$true] %s563_s14 }
  0x46   : > { %1991 = dma.hbm_to_vmem [thread:$0]  (!%p2608_p13), %s562_s10, 1024, %s564_s14, %s2960_s15, %s2461_s12, %s2461_s12, %s2462_s11  }
  0x47   : > { %s599_s26 = scalar_lea.hbm %s2913_s7, %s2619_s22  ;;  %s594_s3 = scalar_lea.vmem [#allocation13], %s2616_s20 }
  0x48   : > { %s602_s25 = sshll.u32 %s594_s3, 4  ;;  %s600_s16 = sshll.u32 %s599_s26, 4  ;;  %s603_s25 = int_to_ptr.vmem [resolvable:$true] %s602_s25  ;;  %s601_s16 = int_to_ptr.hbm [resolvable:$true] %s600_s16 }
  0x49   : > { %s1687_s1 = sshll.u32 %s2606_s28, 7  ;;  %s2961_s4 = scalar_lea.sflag [#allocation12], %s2613_s21 }
  0x4a   : > { %1997 = dma.hbm_to_vmem [thread:$0]  (!%p2608_p13), %s601_s16, 1024, %s603_s25, %s2961_s4, %s2461_s12, %s2461_s12, %s2462_s11  }
  0x4b   : > { %s1905_s13 = sshll.u32 %s2455_s17, 7  ;;  %s633_s22 = scalar_lea.vmem [#allocation16], %s1687_s1 }
  0x4c   : > { %s638_s15 = scalar_lea.hbm %s2915_s9, %s1905_s13  ;;  %s641_s20 = sshll.u32 %s633_s22, 4  ;;  %s642_s20 = int_to_ptr.vmem [resolvable:$true] %s641_s20 }
  0x4d   : > { %s639_s18 = sshll.u32 %s638_s15, 4  ;;  %s2463_s27 = smov 128   ;;  %s640_s18 = int_to_ptr.hbm [resolvable:$true] %s639_s18 }
  0x4e   : > { %s2464_s26 = smov 8   ;;  %s2962_s28 = scalar_lea.sflag [#allocation15], %s2613_s21 }
  0x4f   : > { %2003 = dma.hbm_to_vmem [thread:$0]  (!%p2608_p13), %s640_s18, 2048, %s642_s20, %s2962_s28, %s2463_s27, %s2463_s27, %s2464_s26  }
  0x50   : > { %660 = sbr.rel (%p2636_p2) target bundleno = 915 (0x393), region = 76  ;;  %s2729_s11 = sand.u32 (!%p2636_p2), 1, %s2443_s30  }
  0x51   : > { %s1691_s12 = sshll.u32 (!%p2636_p2), %s2729_s11, 3  ;;  %s663_s3 = scalar_lea.sflag (!%p2636_p2), [#allocation3], %s2729_s11 }
  0x52   : > { %s2733_s25 = scalar_lea.vmem (!%p2636_p2), [#allocation2], %s1691_s12 }
  0x55   : > { %2414 = dma.done.wait (%p2589_p8), %s663_s3, 128  }
  0x56   : > { %2416 = vsyncadd (%p2589_p8), %s663_s3, 4294967168  ;;  %s672_s21 = sand.u32 1, %s2573_s19   ;;  %s1692_s23 = sshll.u32 %s2729_s11, 6 }
  0x57   : > { %s673_s29 = scalar_lea.sflag [#allocation6], %s672_s21  ;;  %s2741_s16 = scalar_lea.vmem [#allocation5], %s1692_s23 }
  0x58   : > { %2418 = dma.done.wait (%p2589_p8), %s673_s29, 1040  }
  0x59   : > { %2420 = vsyncadd (%p2589_p8), %s673_s29, 4294966256  ;;  %s685_s1 = scalar_lea.vmem [#allocation7], %s2729_s11  ;;  %s692_s4 = scalar_lea.sflag [#allocation9], %s672_s21 }
  0x5a   : > { %s2748_s13 = scalar_lea.vmem [#allocation8], %s1692_s23 }
  0x5b   : > { %2422 = dma.done.wait (%p2589_p8), %s692_s4, 2048  }
  0x5c   : > { %2424 = vsyncadd (%p2589_p8), %s692_s4, 4294965248  ;;  %s2754_s19 = scalar_lea.vmem [#allocation10], %s1692_s23  ;;  %s712_s14 = scalar_lea.sflag [#allocation12], %s672_s21 }
  0x5d   : > { %s714_s10 = scalar_lea.vmem [#allocation11], %s2729_s11 }
  0x5e   : > { %2426 = dma.done.wait (%p2589_p8), %s712_s14, 1040  }
  0x5f   : > { %2428 = vsyncadd (%p2589_p8), %s712_s14, 4294966256  ;;  %s2761_s15 = scalar_lea.vmem [#allocation13], %s1692_s23  ;;  %s731_s22 = scalar_lea.sflag [#allocation15], %s672_s21 }
  0x60   : > { %s733_s20 = scalar_lea.vmem [#allocation14], %s2729_s11 }
  0x61   : > { %2430 = dma.done.wait (%p2589_p8), %s731_s22, 2064  }
  0x62   : > { %2432 = vsyncadd (%p2589_p8), %s731_s22, 4294965232  ;;  %v1914_v0 = vld [vmem:[%s2741_s16 + $0x38] sm:$0xff]  ;;  %v1913_v1 = vld [vmem:[%s2741_s16 + $0x30] sm:$0xff]  ;;  %s2963_s18 = sld [smem:[#allocation26_spill]]  ;;  %s1696_s21 = sshll.u32 %s2729_s11, 7 }
  0x63   : > { %918 = vmatpush.bf16.msra.mxu0 %v1914_v0  ;;  %v1922_v2 = vld [vmem:[%s2748_s13 + $0x38] sm:$0xff]  ;;  %v1912_v3 = vld [vmem:[%s2741_s16 + $0x28] sm:$0xff]  ;;  %v1909_v6 = vld [vmem:[%s2741_s16 + $0x10] sm:$0xff]  ;;  %s2964_s28 = sld [smem:[#allocation34_spill]]  ;;  %s2817_s23 = scalar_lea.vmem [#allocation16], %s1696_s21 }
  0x64   : > { %1011 = vmatpush.bf16.msra.mxu1 %v1922_v2  ;;  %v1911_v4 = vld [vmem:[%s2741_s16 + $0x20] sm:$0xff]  ;;  %v1910_v5 = vld [vmem:[%s2741_s16 + $0x18] sm:$0xff]  ;;  %v1908_v7 = vld [vmem:[%s2741_s16 + $0x8] sm:$0xff]  ;;  %s2965_s4 = sld [smem:[#allocation35_spill]] }
  0x65   : > { %v1907_v8 = vld [vmem:[%s2741_s16] sm:$0xff]  ;;  %v1906_v9 = vld [vmem:[%s2733_s25] sm:$0xff]  ;;  %s2968_s26 = sld [smem:[#allocation38_spill]] }
  0x66   : > { %v1921_v10 = vld [vmem:[%s2748_s13 + $0x30] sm:$0xff]  ;;  %v1920_v11 = vld [vmem:[%s2748_s13 + $0x28] sm:$0xff]  ;;  %v1919_v12 = vld [vmem:[%s2748_s13 + $0x20] sm:$0xff] }
  0x67   : > { %919 = vmatpush.bf16.msra.mxu0 %v1913_v1  ;;  %v1918_v13 = vld [vmem:[%s2748_s13 + $0x18] sm:$0xff]  ;;  %v1917_v14 = vld [vmem:[%s2748_s13 + $0x10] sm:$0xff]  ;;  %v1916_v15 = vld [vmem:[%s2748_s13 + $0x8] sm:$0xff] }
  0x68   : > { %p834_p3 = scmp.lt.s32.totalorder %s2963_s18, 2  ;;  %1012 = vmatpush.bf16.msra.mxu1 %v1921_v10  ;;  %v1915_v16 = vld [vmem:[%s2748_s13] sm:$0xff]  ;;  %v1930_v17 = vld [vmem:[%s2754_s19 + $0x38] sm:$0xff]  ;;  %v2064_v18 = vld [vmem:[%s685_s1] ss:$0 sm:$0xff]  ;;  %s1955_s3 = sshll.u32 %s2963_s18, 4 }
  0x69   : > { %1104 = vmatpush.bf16.msra.mxu2 %v1930_v17  ;;  %v1929_v34 = vld [vmem:[%s2754_s19 + $0x30] sm:$0xff]  ;;  %v1928_v35 = vld [vmem:[%s2754_s19 + $0x28] sm:$0xff]  ;;  %v1927_v36 = vld [vmem:[%s2754_s19 + $0x20] sm:$0xff] }
  0x6a   : > { %s2780_s24 = scalar_select %p834_p3, %s2963_s18, 2  ;;  %v1926_v37 = vld [vmem:[%s2754_s19 + $0x18] sm:$0xff]  ;;  %v1925_v38 = vld [vmem:[%s2754_s19 + $0x10] sm:$0xff]  ;;  %v1924_v39 = vld [vmem:[%s2754_s19 + $0x8] sm:$0xff] }
  0x6b   : > { %920 = vmatpush.bf16.msra.mxu0 %v1912_v3  ;;  %v1923_v40 = vld [vmem:[%s2754_s19] sm:$0xff]  ;;  %v1937_v58 = vld [vmem:[%s2761_s15 + $0x30] sm:$0xff]  ;;  %v1936_v59 = vld [vmem:[%s2761_s15 + $0x28] sm:$0xff]  ;;  %s1383_s18 = scalar_lea.sflag [#allocation4], %s2729_s11 }
  0x6c   : > { %s836_s12 = scalar_lea.vmem %s2964_s28, %s2780_s24  ;;  %1013 = vmatpush.bf16.msra.mxu1 %v1920_v11  ;;  %v1938_v41 = vld [vmem:[%s2761_s15 + $0x38] sm:$0xff]  ;;  %v1935_v60 = vld [vmem:[%s2761_s15 + $0x20] sm:$0xff]  ;;  %v1933_v62 = vld [vmem:[%s2761_s15 + $0x10] sm:$0xff]  ;;  %s1698_s29 = sshll.u32 %s2780_s24, 1 }
  0x6d   : > { %1105 = vmatpush.bf16.msra.mxu2 %v1929_v34  ;;  %v2065_v42 = vld [vmem:[%s836_s12] ss:$0 sm:$0xff]  ;;  %1197 = vmatpush.bf16.msra.mxu3 %v1938_v41  ;;  %v1934_v61 = vld [vmem:[%s2761_s15 + $0x18] sm:$0xff]  ;;  %v1931_v0 = vld [vmem:[%s2761_s15] sm:$0xff]  ;;  %s840_s13 = scalar_lea.vmem %s2965_s4, %s1698_s29  ;;  %s1697_s12 = sshll.u32 %s2729_s11, 4 }
  0x6e   : > { %v1932_v63 = vld [vmem:[%s2761_s15 + $0x8] sm:$0xff]  ;;  %v1889_v1 = vld [vmem:[%s2817_s23 + $0x70] sm:$0xf]  ;;  %v1954_v2 = vld [vmem:[%s2817_s23 + $0x74] sm:$0xf0]  ;;  %s832_s16 = scalar_lea.vmem [#allocation17], %s1697_s12 }
  0x6f   : > { %921 = vmatpush.bf16.msra.mxu0 %v1911_v4  ;;  %v1953_v3 = vld [vmem:[%s2817_s23 + $0x74] sm:$0xf]  ;;  %v2066_v4 = vld [vmem:[%s714_s10] ss:$0 sm:$0xff]  ;;  %v1857_v41 = vld [vmem:[%s2817_s23 + $0x30] sm:$0xf] }
  0x70   : > { %1014 = vmatpush.bf16.msra.mxu1 %v1919_v12  ;;  %s2966_s10 = sld [smem:[#allocation36_spill]]  ;;  %s1397_s4 = sshll.u32 %s832_s16, 4  ;;  %s1398_s4 = int_to_ptr.vmem [resolvable:$true] %s1397_s4 }
  0x71   : > { %1106 = vmatpush.bf16.msra.mxu2 %v1928_v35  ;;  %1198 = vmatpush.bf16.msra.mxu3 %v1937_v58  ;;  %v1865_v35 = vld [vmem:[%s2817_s23 + $0x40] sm:$0xf] }
  0x73   : > { %922 = vmatpush.bf16.msra.mxu0 %v1910_v5  ;;  %v1890_v5 = vor.u32 %v1954_v2, %v1889_v1  ;;  %v2067_v1 = vld [vmem:[%s733_s20] ss:$0 sm:$0xff]  ;;  %s2967_s20 = sld [smem:[#allocation37_spill]] }
  0x74   : > { %1015 = vmatpush.bf16.msra.mxu1 %v1918_v13 }
  0x75   : > { %1107 = vmatpush.bf16.msra.mxu2 %v1927_v36  ;;  %1199 = vmatpush.bf16.msra.mxu3 %v1936_v59  ;;  %v1948_v36 = vld [vmem:[%s2817_s23 + $0x44] sm:$0xf0]  ;;  %v1833_v59 = vld [vmem:[%s2817_s23] sm:$0xf] }
  0x77   : > { %923 = vmatpush.bf16.msra.mxu0 %v1909_v6  ;;  %v1891_v6 = vld [vmem:[%s2817_s23 + $0x78] sm:$0xf0] }
  0x78   : > { %1016 = vmatpush.bf16.msra.mxu1 %v1917_v14 }
  0x79   : > { %1108 = vmatpush.bf16.msra.mxu2 %v1926_v37  ;;  %1200 = vmatpush.bf16.msra.mxu3 %v1935_v60  ;;  %v1947_v37 = vld [vmem:[%s2817_s23 + $0x44] sm:$0xf]  ;;  %v1940_v60 = vld [vmem:[%s2817_s23 + $0x4] sm:$0xf0] }
  0x7b   : > { %924 = vmatpush.bf16.msra.mxu0 %v1908_v7  ;;  %v1894_v7 = vor.u32 %v1953_v3, %v1891_v6 }
  0x7c   : > { %1017 = vmatpush.bf16.msra.mxu1 %v1916_v15 }
  0x7d   : > { %1109 = vmatpush.bf16.msra.mxu2 %v1925_v38  ;;  %1201 = vmatpush.bf16.msra.mxu3 %v1934_v61  ;;  %v1866_v38 = vor.u32 %v1948_v36, %v1865_v35  ;;  %v1939_v61 = vld [vmem:[%s2817_s23 + $0x4] sm:$0xf] }
  0x7f   : > { %925 = vmatpush.bf16.msra.mxu0 %v1907_v8 }
  0x80   : > { %1018 = vmatpush.bf16.msra.mxu1 %v1915_v16 }
  0x81   : > { %1110 = vmatpush.bf16.msra.mxu2 %v1924_v39  ;;  %1202 = vmatpush.bf16.msra.mxu3 %v1933_v62  ;;  %v1867_v39 = vld [vmem:[%s2817_s23 + $0x48] sm:$0xf0]  ;;  %v1834_v62 = vor.u32 %v1940_v60, %v1833_v59 }
  0x82   : > { %926 = vmatmul.bf16.vlgmr.msra.gmra.mxu0 %v1906_v9 }
  0x83   : > { %1324 = vmatpush.bf16.msrb.mxu0 %v1890_v5 }
  0x84   : > { %1338 = vmatpush.bf16.msrb.mxu1 %v1894_v7 }
  0x85   : > { %1111 = vmatpush.bf16.msra.mxu2 %v1923_v40  ;;  %1203 = vmatpush.bf16.msra.mxu3 %v1932_v63  ;;  %v1870_v40 = vor.u32 %v1947_v37, %v1867_v39  ;;  %v1835_v63 = vld [vmem:[%s2817_s23 + $0x8] sm:$0xf0] }
  0x89   : > { %1204 = vmatpush.bf16.msra.mxu3 %v1931_v0  ;;  %v1838_v0 = vor.u32 %v1939_v61, %v1835_v63 }
  0xff   : > { %v927_v19 = vpop.f32.mrf.mxu0 }
 0x100   : > { %v928_v20 = vadd.f32 %v2064_v18, %v927_v19 }
 0x102   : > { %v932_v21 = vmul.f32 0.5, %v928_v20 }
 0x104   : > { %2071 = vtanh.f32 %v932_v21 }
 0x107   : > { %v929_v22 = vpop.f32.mrf.mxu0 }
 0x108   : > { %v930_v23 = vadd.f32 %v2064_v18, %v929_v22 }
 0x10a   : > { %v933_v24 = vmul.f32 0.5, %v930_v23  ;;  %v2072_v25 = vpop.eup %2071 }
 0x10b   : > { %v936_v26 = vmul.f32 0.5, %v2072_v25  ;;  %v1951_v25 = vld [vmem:[%s2817_s23 + $0x64] sm:$0xf] }
 0x10c   : > { %2073 = vtanh.f32 %v933_v24  ;;  %v1952_v24 = vld [vmem:[%s2817_s23 + $0x64] sm:$0xf0] }
 0x10d   : > { %v938_v28 = vadd.f32 0.5, %v936_v26 }
 0x10f   : > { %v940_v31 = vmul.f32 %v938_v28, %v928_v20 }
 0x112   : > { %v2074_v27 = vpop.eup %2073 }
 0x113   : > { %v937_v29 = vmul.f32 0.5, %v2074_v27  ;;  %v1883_v27 = vld [vmem:[%s2817_s23 + $0x68] sm:$0xf0] }
 0x114   : > { %v1886_v28 = vor.u32 %v1951_v25, %v1883_v27 }
 0x115   : > { %v939_v30 = vadd.f32 0.5, %v937_v29  ;;  %v1873_v29 = vld [vmem:[%s2817_s23 + $0x50] sm:$0xf] }
 0x116   : > { %1339 = vmatpush.bf16.msrb.mxu1 %v1886_v28 }
 0x117   : > { %v941_v32 = vmul.f32 %v939_v30, %v930_v23  ;;  %v1881_v23 = vld [vmem:[%s2817_s23 + $0x60] sm:$0xf]  ;;  %v1950_v30 = vld [vmem:[%s2817_s23 + $0x54] sm:$0xf0] }
 0x118   : > { %v1882_v26 = vor.u32 %v1952_v24, %v1881_v23 }
 0x119   : > { %v942_v33 = vpack.c.bf16 %v941_v32, %v940_v31  ;;  %v1949_v31 = vld [vmem:[%s2817_s23 + $0x54] sm:$0xf]  ;;  %v1874_v32 = vor.u32 %v1950_v30, %v1873_v29  ;;  %v2069_v30 = vld [vmem:[%s2967_s20] ss:$0 sm:$0xff] }
 0x11a   : > { %1325 = vmatpush.bf16.msrb.mxu0 %v1882_v26 }
 0x11b   : > { %1019 = vmatmul.bf16.vlgmr.msra.gmra.mxu1 %v942_v33  ;;  %v1875_v33 = vld [vmem:[%s2817_s23 + $0x58] sm:$0xf0] }
 0x11c   : > { %v1878_v34 = vor.u32 %v1949_v31, %v1875_v33 }
 0x11e   : > { %1326 = vmatpush.bf16.msrb.mxu0 %v1874_v32  ;;  %1340 = vmatpush.bf16.msrb.mxu1 %v1878_v34  ;;  %v2070_v34 = vld [vmem:[%s2968_s26] ss:$0 sm:$0xff] }
 0x122   : > { %1327 = vmatpush.bf16.msrb.mxu0 %v1866_v38  ;;  %1341 = vmatpush.bf16.msrb.mxu1 %v1870_v40 }
 0x198   : > { %v1020_v43 = vpop.f32.mrf.mxu1 }
 0x199   : > { %v1021_v44 = vadd.f32 %v2065_v42, %v1020_v43  ;;  %v1945_v43 = vld [vmem:[%s2817_s23 + $0x34] sm:$0xf] }
 0x19b   : > { %v1025_v45 = vmul.f32 0.5, %v1021_v44 }
 0x19d   : > { %2075 = vtanh.f32 %v1025_v45  ;;  %v1859_v45 = vld [vmem:[%s2817_s23 + $0x38] sm:$0xf0] }
 0x1a0   : > { %v1022_v46 = vpop.f32.mrf.mxu1 }
 0x1a1   : > { %v1023_v47 = vadd.f32 %v2065_v42, %v1022_v46  ;;  %v1946_v42 = vld [vmem:[%s2817_s23 + $0x34] sm:$0xf0]  ;;  %v1862_v46 = vor.u32 %v1945_v43, %v1859_v45 }
 0x1a3   : > { %v1026_v48 = vmul.f32 0.5, %v1023_v47  ;;  %v2076_v49 = vpop.eup %2075  ;;  %1342 = vmatpush.bf16.msrb.mxu1 %v1862_v46 }
 0x1a4   : > { %v1029_v50 = vmul.f32 0.5, %v2076_v49  ;;  %v1943_v49 = vld [vmem:[%s2817_s23 + $0x24] sm:$0xf] }
 0x1a5   : > { %2077 = vtanh.f32 %v1026_v48  ;;  %v1944_v48 = vld [vmem:[%s2817_s23 + $0x24] sm:$0xf0] }
 0x1a6   : > { %v1031_v52 = vadd.f32 0.5, %v1029_v50 }
 0x1a8   : > { %v1033_v55 = vmul.f32 %v1031_v52, %v1021_v44  ;;  %v1858_v44 = vor.u32 %v1946_v42, %v1857_v41 }
 0x1aa   : > { %1328 = vmatpush.bf16.msrb.mxu0 %v1858_v44 }
 0x1ab   : > { %v2078_v51 = vpop.eup %2077 }
 0x1ac   : > { %v1030_v53 = vmul.f32 0.5, %v2078_v51  ;;  %v1851_v51 = vld [vmem:[%s2817_s23 + $0x28] sm:$0xf0] }
 0x1ad   : > { %v1854_v52 = vor.u32 %v1943_v49, %v1851_v51 }
 0x1ae   : > { %v1032_v54 = vadd.f32 0.5, %v1030_v53  ;;  %v1841_v53 = vld [vmem:[%s2817_s23 + $0x10] sm:$0xf] }
 0x1af   : > { %1343 = vmatpush.bf16.msrb.mxu1 %v1854_v52 }
 0x1b0   : > { %v1034_v56 = vmul.f32 %v1032_v54, %v1023_v47  ;;  %v1849_v47 = vld [vmem:[%s2817_s23 + $0x20] sm:$0xf]  ;;  %v1942_v54 = vld [vmem:[%s2817_s23 + $0x14] sm:$0xf0] }
 0x1b1   : > { %v1850_v50 = vor.u32 %v1944_v48, %v1849_v47 }
 0x1b2   : > { %v1035_v57 = vpack.c.bf16 %v1034_v56, %v1033_v55  ;;  %v1941_v55 = vld [vmem:[%s2817_s23 + $0x14] sm:$0xf]  ;;  %v1842_v56 = vor.u32 %v1942_v54, %v1841_v53 }
 0x1b3   : > { %1329 = vmatpush.bf16.msrb.mxu0 %v1850_v50 }
 0x1b4   : > { %1112 = vmatmul.bf16.vlgmr.msra.gmra.mxu2 %v1035_v57  ;;  %v1843_v57 = vld [vmem:[%s2817_s23 + $0x18] sm:$0xf0]  ;;  %s2969_s23 = sld [smem:[#allocation39_spill]] }
 0x1b5   : > { %v1846_v58 = vor.u32 %v1941_v55, %v1843_v57 }
 0x1b7   : > { %1330 = vmatpush.bf16.msrb.mxu0 %v1842_v56  ;;  %1344 = vmatpush.bf16.msrb.mxu1 %v1846_v58 }
 0x1ba   : > { %s1396_s29 = scalar_lea.hbm %s2969_s23, %s1955_s3  ;;  %s2381_s22 = scalar_lea.hbm %s2969_s23, 48 }
 0x1bb   : > { %1331 = vmatpush.bf16.msrb.mxu0 %v1834_v62  ;;  %1345 = vmatpush.bf16.msrb.mxu1 %v1838_v0 }
 0x237   : > { %v1113_v8 = vpop.f32.mrf.mxu2 }
 0x238   : > { %v1114_v9 = vadd.f32 %v2066_v4, %v1113_v8 }
 0x23a   : > { %v1118_v10 = vmul.f32 0.5, %v1114_v9 }
 0x23c   : > { %2079 = vtanh.f32 %v1118_v10 }
 0x23f   : > { %v1115_v11 = vpop.f32.mrf.mxu2 }
 0x240   : > { %v1116_v12 = vadd.f32 %v2066_v4, %v1115_v11 }
 0x242   : > { %v1119_v13 = vmul.f32 0.5, %v1116_v12  ;;  %v2080_v14 = vpop.eup %2079 }
 0x243   : > { %v1122_v15 = vmul.f32 0.5, %v2080_v14 }
 0x244   : > { %2081 = vtanh.f32 %v1119_v13 }
 0x245   : > { %v1124_v17 = vadd.f32 0.5, %v1122_v15 }
 0x247   : > { %v1126_v20 = vmul.f32 %v1124_v17, %v1114_v9  ;;  %v1238_v17 = vld [vmem:[%s840_s13] sm:$0x3]  ;;  %s1399_s13 = sshll.u32 %s1396_s29, 4  ;;  %s1400_s13 = int_to_ptr.hbm [resolvable:$true] %s1399_s13 }
 0x248   : > { %v1240_v32 = vperm.slane %v1238_v17, 0  ;;  %s2375_s19 = sshra.s32 %s1400_s13, 4  ;;  %s2376_s19 = int_to_ptr.hbm [resolvable:$true] %s2375_s19 }
 0x249   : > { %s2377_s14 = scalar_lea.hbm %s2376_s19, 16  ;;  %p2382_p7 = scmp.lt.s32.totalorder %s2376_s19, %s2969_s23 }
 0x24a   : > { %v2082_v16 = vpop.eup %2081  ;;  %p2378_p4 = scmp.ne.s32.totalorder %s2376_s19, %s2377_s14  ;;  %p2383_p8 = scmp.lt.s32.totalorder %s2381_s22, %s2377_s14 }
 0x24b   : > { %v1123_v18 = vmul.f32 0.5, %v2082_v16 }
 0x24c   : > { %p2379_p5 = pnand %p2378_p4, %p2593_p9  ;;  %p2384_p10 = por %p2383_p8, %p2382_p7 }
 0x24d   : > { %v1125_v19 = vadd.f32 0.5, %v1123_v18  ;;  %v1241_v18 = vperm.slane %v1238_v17, 1 }
 0x24e   : > { %p2380_p6 = pneg %p2379_p5 }
 0x24f   : > { %v1127_v21 = vmul.f32 %v1125_v19, %v1116_v12  ;;  %v2068_v19 = vld [vmem:[%s2966_s10] ss:$0 sm:$0xff] }
 0x250   : > { %p2385_p12 = pnand %p2384_p10, %p2380_p6 }
 0x251   : > { %v1128_v22 = vpack.c.bf16 %v1127_v21, %v1126_v20 }
 0x253   : > { %1205 = vmatmul.bf16.vlgmr.msra.gmra.mxu3 %v1128_v22 }
 0x2d6   : > { %v1206_v2 = vpop.f32.mrf.mxu3 }
 0x2d7   : > { %v1207_v3 = vadd.f32 %v2067_v1, %v1206_v2 }
 0x2d9   : > { %v1211_v4 = vmul.f32 0.5, %v1207_v3 }
 0x2db   : > { %2083 = vtanh.f32 %v1211_v4 }
 0x2de   : > { %v1208_v5 = vpop.f32.mrf.mxu3 }
 0x2df   : > { %v1209_v6 = vadd.f32 %v2067_v1, %v1208_v5 }
 0x2e1   : > { %v1212_v7 = vmul.f32 0.5, %v1209_v6  ;;  %v2084_v8 = vpop.eup %2083 }
 0x2e2   : > { %v1215_v9 = vmul.f32 0.5, %v2084_v8 }
 0x2e3   : > { %2085 = vtanh.f32 %v1212_v7 }
 0x2e4   : > { %v1217_v11 = vadd.f32 0.5, %v1215_v9 }
 0x2e6   : > { %v1219_v14 = vmul.f32 %v1217_v11, %v1207_v3 }
 0x2e9   : > { %v2086_v10 = vpop.eup %2085 }
 0x2ea   : > { %v1216_v12 = vmul.f32 0.5, %v2086_v10 }
 0x2ec   : > { %v1218_v13 = vadd.f32 0.5, %v1216_v12 }
 0x2ee   : > { %v1220_v15 = vmul.f32 %v1218_v13, %v1209_v6 }
 0x2f0   : > { %v1221_v16 = vpack.c.bf16 %v1220_v15, %v1219_v14 }
 0x2f2   : > { %1332 = vmatmul.bf16.vlgmr.msrb.gmra.mxu0 %v1221_v16  ;;  %1346 = vmatmul.bf16.vlgmr.msrb.gmra.mxu1 %v1221_v16 }
 0x36f   : > { %v1347_v20 = vpop.f32.mrf.mxu1  ;;  %v1333_v31 = vpop.f32.mrf.mxu0 }
 0x370   : > { %v1348_v21 = vadd.f32 %v1347_v20, %v1241_v18  ;;  %v1334_v36 = vadd.f32 %v1333_v31, %v1240_v32 }
 0x372   : > { %v1356_v22 = vsub.f32 %v1348_v21, %v2068_v19 }
 0x374   : > { %v1358_v23 = vmul.f32 0.5, %v1356_v22 }
 0x376   : > { %2087 = vtanh.f32 %v1358_v23 }
 0x377   : > { %v1349_v24 = vpop.f32.mrf.mxu1  ;;  %v1335_v42 = vpop.f32.mrf.mxu0 }
 0x378   : > { %v1350_v25 = vadd.f32 %v1349_v24, %v1241_v18  ;;  %v1336_v44 = vadd.f32 %v1335_v42, %v1240_v32 }
 0x37a   : > { %v1357_v26 = vsub.f32 %v1350_v25, %v2068_v19 }
 0x37c   : > { %v2088_v27 = vpop.eup %2087  ;;  %v1359_v28 = vmul.f32 0.5, %v1357_v26 }
 0x37d   : > { %v1362_v29 = vmul.f32 0.5, %v2088_v27 }
 0x37e   : > { %2089 = vtanh.f32 %v1359_v28 }
 0x37f   : > { %v1364_v33 = vadd.f32 0.5, %v1362_v29 }
 0x381   : > { %v1371_v35 = vmul.f32 %v2069_v30, %v1364_v33 }
 0x383   : > { %v1376_v37 = vadd.f32 %v2070_v34, %v1371_v35 }
 0x384   : > { %v2090_v38 = vpop.eup %2089 }
 0x385   : > { %v1378_v39 = vadd.f32 %v1376_v37, %v1334_v36  ;;  %v1363_v40 = vmul.f32 0.5, %v2090_v38 }
 0x387   : > { %v1365_v41 = vadd.f32 0.5, %v1363_v40  ;;  %1380 = vst [vmem:[%s832_s16] sm:$0xff] %v1378_v39 }
 0x389   : > { %v1372_v43 = vmul.f32 %v2069_v30, %v1365_v41 }
 0x38b   : > { %v1377_v45 = vadd.f32 %v2070_v34, %v1372_v43 }
 0x38d   : > { %v1379_v46 = vadd.f32 %v1377_v45, %v1336_v44 }
 0x38f   : > { %1381 = vst [vmem:[%s832_s16 + $0x8] sm:$0xff] %v1379_v46 }
 0x390   : > { %2388 = shalt.err (!%p2385_p12)
}
 0x391   : > { %s2465_s11 = smov 128   ;;  %s2466_s27 = smov 8  }
 0x392   : > { %1974 = dma.vmem_to_hbm [thread:$0]  (%p2593_p9), %s1398_s4, 256, %s1400_s13, %s1383_s18, %s2465_s11, %s2465_s11, %s2466_s27  }
 0x393 PF: > { %s2971_s26 = sld [smem:[#allocation27_spill]] }
 0x394   : > { %s2972_s12 = sld [smem:[#allocation24_spill]] }
 0x399   : > { %p2009_p13 = scmp.ge.s32.totalorder %s2971_s26, 2 }
 0x39a   : > { %s1414_s25 = sand.u32 1, %s2972_s12  }
 0x39b   : > { %p2005_p0 = pnand %p2009_p13, %p2600_p11  ;;  %s1415_s21 = scalar_lea.sflag [#allocation4], %s1414_s25 }
 0x39d   : > { %p2006_p1 = pneg %p2005_p0 }
 0x39f   : > { %2434 = dma.done.wait (%p2006_p1), %s1415_s21, 256  }
 0x3a0   : > { %2436 = vsyncadd (%p2006_p1), %s1415_s21, 4294967040  ;;  %s42_s18 = sadd.s32 1, %s2971_s26   ;;  %s2974_s16 = sld [smem:[#allocation25_spill]] }
 0x3a1   : > { %p39_p2 = scmp.ge.s32.totalorder %s42_s18, 5   ;;  %s2975_s15 = sld [smem:[#allocation30_spill]] }
 0x3a2   : > { %s2976_s1 = sld [smem:[#allocation28_spill]]  ;;  %s2977_s29 = smov %s2443_s30 }
 0x3a4   :  { %41 = sbr.rel (!%p39_p2) target bundleno = 23 (0x17), region = 223 }
 0x3a6   : > { %s2978_s30 = smov %s2974_s16  ;;  %s2979_s16 = smov %s2455_s17 }
 0x3a8   : > { %s2980_s17 = smov %s2976_s1 }
 0x3a9   :  { %1421 = vsyncpa [#allocation3], 1 }
 0x3aa   :  { %1423 = vsyncpa [#allocation3 + $0x1], 1 }
 0x3ab   :  { %1424 = vsyncpa [#allocation6], 1 }
 0x3ac   :  { %1426 = vsyncpa [#allocation6 + $0x1], 1 }
 0x3ad   :  { %1427 = vsyncpa [#allocation9], 1 }
 0x3ae   :  { %1429 = vsyncpa [#allocation9 + $0x1], 1 }
 0x3af   :  { %1430 = vsyncpa [#allocation12], 1 }
 0x3b0   :  { %1432 = vsyncpa [#allocation12 + $0x1], 1 }
 0x3b1   :  { %1433 = vsyncpa [#allocation15], 1 }
 0x3b2   :  { %1435 = vsyncpa [#allocation15 + $0x1], 1 }
 0x3b3   :  { %1436 = vsyncpa [#allocation4], 1 }
 0x3b4   :  { %1438 = vsyncpa [#allocation4 + $0x1], 1 }

</bundles_post_ra>
